<compile_context>
chip_gen: v7x
topology: tpu7x:2x2x1
jax: 0.10.0
libtpu: 0.0.40
codegen_flags: <defaults>
</compile_context>

<pallas_src>
import functools
import math

import jax
import jax.numpy as jnp
from jax.experimental import pallas as pl
from jax.experimental.pallas import tpu as pltpu


# ----------------------------- interpolation weights -----------------------------

def _align_corners_weights(in_size: int, out_size: int) -> jax.Array:
    """Dense (out_size, in_size) fp32 interpolation matrix, align_corners=True."""
    if out_size == 1 or in_size == 1:
        # Degenerate: every output samples input index 0 (PyTorch semantics).
        w = jnp.zeros((out_size, in_size), jnp.float32)
        return w.at[:, 0].set(1.0)
    scale = (in_size - 1) / (out_size - 1)
    src = jnp.arange(out_size, dtype=jnp.float32) * scale
    i0 = jnp.clip(jnp.floor(src).astype(jnp.int32), 0, in_size - 1)
    i1 = jnp.clip(i0 + 1, 0, in_size - 1)
    frac = src - i0.astype(jnp.float32)
    rows = jnp.arange(out_size)
    w = jnp.zeros((out_size, in_size), jnp.float32)
    w = w.at[rows, i0].add(1.0 - frac)
    w = w.at[rows, i1].add(frac)
    return w


# ----------------------------- VMEM planning -----------------------------

def _physical_vmem_bytes() -> int:
    """Per-core physical VMEM; conservative 64 MiB (v7x) if the query fails."""
    try:
        info = pltpu.get_tpu_info()
        v = getattr(info, "vmem_capacity_bytes", None)
        if v:
            return int(v)
    except Exception:
        pass
    return 64 << 20


def _vmem_plan():
    phys = _physical_vmem_bytes()
    # Working-set target for pipelined blocks + intermediates:
    #   128 MiB-class chips (v5e/v6e) -> 32 MiB, v7x (64 MiB/TC) -> ~21 MiB.
    budget = max(8 << 20, min(phys // 3, 32 << 20))
    # Scoped-VMEM limit handed to Mosaic; leave headroom for internal scratch.
    limit = min((phys * 3) // 4, budget + (16 << 20))
    return budget, limit


def _choose_plane_block(num_planes, per_plane_bytes, budget_bytes, *, mult8):
    """Planes per grid step: as large as the VMEM budget allows, but keep >= 4
    grid steps when there is enough work so v7x's two TensorCores each get >= 2
    pipelined blocks. `mult8`: 2-D blocks need an 8-aligned sublane dim unless the
    block covers the whole axis."""
    cap = max(1, int(budget_bytes) // max(int(per_plane_bytes), 1))
    if num_planes <= 8:
        return num_planes                       # single tiny block; nothing to shard
    tc = min(cap, num_planes, max(1, pl.cdiv(num_planes, 4)))
    if tc >= num_planes:
        return num_planes
    if mult8:
        tc = max(8, (tc // 8) * 8)
    return max(1, min(tc, num_planes))


# ----------------------------- kernels -----------------------------

def _fused_kernel(w_ref, x_ref, o_ref):
    # w_ref: (H_in*W_in, H_out*W_out) = kron(A^T, B), resident in VMEM.
    # x_ref: (tc, H_in*W_in) lane-dense slab (one plane per row).
    # o_ref: (tc, H_out*W_out) lane-dense slab.
    x = x_ref[...].astype(w_ref.dtype)
    o_ref[...] = jnp.dot(x, w_ref[...],
                         preferred_element_type=jnp.float32).astype(o_ref.dtype)


def _separable_kernel(a_ref, b_ref, x_ref, o_ref, *, compute_dtype):
    # a_ref: (H_out, H_in), b_ref: (W_in, W_out), x_ref: (tc, H_in, W_in).
    x = x_ref[...].astype(compute_dtype)
    tc, h_in, w_in = x.shape
    w_out = b_ref.shape[1]

    # Column interpolation folded across the plane batch: one large MXU matmul.
    y = jnp.dot(x.reshape(tc * h_in, w_in), b_ref[...],
                preferred_element_type=jnp.float32)
    y = y.reshape(tc, h_in, w_out).astype(compute_dtype)

    # Row interpolation as ONE large matmul (no broadcast-A, no batched tiny
    # matmuls): contract h_in of y with h_in of A -> (tc, W_out, H_out), then one
    # XLU minor-dims transpose before the store.
    out_t = jax.lax.dot_general(
        y, a_ref[...],
        dimension_numbers=(((1,), (1,)), ((), ())),
        preferred_element_type=jnp.float32)          # (tc, W_out, H_out)
    o_ref[...] = jnp.swapaxes(out_t, 1, 2).astype(o_ref.dtype)


# ----------------------------- wrapper -----------------------------

def interpolate_bilinear(x: jax.Array, sc, compute_dtype=None) -> jax.Array:
    """x: (N, C, H, W). Returns (N, C, floor(H*sc), floor(W*sc)), align_corners=True."""
    n, c, h_in, w_in = x.shape
    if isinstance(sc, (tuple, list)):
        sc_h, sc_w = sc
    else:
        sc_h = sc_w = sc
    h_out = int(math.floor(h_in * sc_h))
    w_out = int(math.floor(w_in * sc_w))

    if compute_dtype is None:
        # bf16 is MXU-native on all generations; keep fp32 inputs exact by default.
        compute_dtype = jnp.bfloat16 if x.dtype == jnp.bfloat16 else jnp.float32
    compute_dtype = jnp.dtype(compute_dtype)
    cd_size = compute_dtype.itemsize
    io_size = x.dtype.itemsize

    # Weights built in fp32 (same weight math PyTorch uses), narrowed only
    # together with the matmul compute dtype.
    a = _align_corners_weights(h_in, h_out)          # (H_out, H_in) row weights
    b = _align_corners_weights(w_in, w_out).T        # (W_in, W_out) col weights

    num_planes = n * c
    budget, vmem_limit = _vmem_plan()

    in_elems = h_in * w_in
    out_elems = h_out * w_out
    fused_w_bytes = in_elems * out_elems * cd_size

    # Fused lane-dense path while the kron weight stays small (decoder-size maps);
    # larger maps fall back to the separable path (W_out >= 128 there anyway).
    use_fused = (2 * fused_w_bytes) <= min(budget // 2, 8 << 20)

    compiler_params = pltpu.CompilerParams(
        dimension_semantics=("parallel",),            # megacore / v7x 2-TC sharding
        vmem_limit_bytes=int(vmem_limit))

    if use_fused:
        # Full bilinear map as one weight: W[hi*W_in+wi, ho*W_out+wo] = A[ho,hi]*B[wi,wo].
        w_full = jnp.kron(a.T, b).astype(compute_dtype)   # (H_in*W_in, H_out*W_out)

        per_plane = (2 * in_elems * io_size            # double-buffered input block
                     + 2 * out_elems * io_size         # double-buffered output block
                     + (in_elems * cd_size if x.dtype != compute_dtype else 0)
                     + out_elems * 4)                  # fp32 matmul result
        tc = _choose_plane_block(num_planes, per_plane,
                                 budget - 2 * fused_w_bytes, mult8=True)
        num_blocks = pl.cdiv(num_planes, tc)           # ragged last block OK (masked)

        x_flat = x.reshape(num_planes, in_elems)        # free reshape (contiguous)

        out_flat = pl.pallas_call(
            _fused_kernel,
            out_shape=jax.ShapeDtypeStruct((num_planes, out_elems), x.dtype),
            grid_spec=pltpu.PrefetchScalarGridSpec(
                num_scalar_prefetch=0,
                grid=(num_blocks,),
                in_specs=[
                    pl.BlockSpec((in_elems, out_elems), lambda i: (0, 0)),  # W, resident
                    pl.BlockSpec((tc, in_elems), lambda i: (i, 0)),         # plane slab
                ],
                out_specs=pl.BlockSpec((tc, out_elems), lambda i: (i, 0)),  # lane-dense
            ),
            compiler_params=compiler_params,
        )(w_full, x_flat)
        return out_flat.reshape(n, c, h_out, w_out)     # free reshape (contiguous)

    # ---------------- separable fallback (large feature maps) ----------------
    # TODO(synk): above ~512-wide feature maps, band A / use a 2-tap gather+FMA row
    # stage and tile spatially so a single plane never exceeds the VMEM budget.
    def _r(v, m):
        return ((v + m - 1) // m) * m

    per_plane = (2 * _r(h_in, 8) * _r(w_in, 128) * io_size
                 + 2 * _r(h_out, 8) * _r(w_out, 128) * io_size
                 + _r(h_in, 8) * _r(w_in, 128) * cd_size          # x cast
                 + _r(h_in, 8) * _r(w_out, 128) * max(4, cd_size)  # y
                 + 2 * _r(h_out, 8) * _r(w_out, 128) * 4)          # fp32 out + transpose
    fixed = 2 * (_r(h_out, 8) * _r(h_in, 128)
                 + _r(w_in, 8) * _r(w_out, 128)) * cd_size         # resident A/B buffers
    tc = _choose_plane_block(num_planes, per_plane,
                             max(budget - fixed, 1 << 20), mult8=False)
    num_blocks = pl.cdiv(num_planes, tc)

    x_flat = x.reshape(num_planes, h_in, w_in)
    a_c = a.astype(compute_dtype)
    b_c = b.astype(compute_dtype)

    kernel = functools.partial(_separable_kernel, compute_dtype=compute_dtype)
    out_flat = pl.pallas_call(
        kernel,
        out_shape=jax.ShapeDtypeStruct((num_planes, h_out, w_out), x.dtype),
        grid_spec=pltpu.PrefetchScalarGridSpec(
            num_scalar_prefetch=0,
            grid=(num_blocks,),
            in_specs=[
                pl.BlockSpec((h_out, h_in), lambda i: (0, 0)),        # A, resident
                pl.BlockSpec((w_in, w_out), lambda i: (0, 0)),        # B, resident
                pl.BlockSpec((tc, h_in, w_in), lambda i: (i, 0, 0)),  # plane block
            ],
            out_specs=pl.BlockSpec((tc, h_out, w_out), lambda i: (i, 0, 0)),
        ),
        compiler_params=compiler_params,
    )(a_c, b_c, x_flat)
    return out_flat.reshape(n, c, h_out, w_out)


# ----------------------------- reference & test -----------------------------

def _reference(x, sc):
    """Pure-JAX fp32 reference (no Pallas)."""
    n, c, h_in, w_in = x.shape
    if isinstance(sc, (tuple, list)):
        sc_h, sc_w = sc
    else:
        sc_h = sc_w = sc
    h_out = int(math.floor(h_in * sc_h))
    w_out = int(math.floor(w_in * sc_w))
    a = _align_corners_weights(h_in, h_out)
    wmat = _align_corners_weights(w_in, w_out)
    return jnp.einsum("oh,nchw,pw->ncop", a, x.astype(jnp.float32), wmat)


if __name__ == "__main__":
    key = jax.random.PRNGKey(0)
    sc = 2.0
    x = jax.random.normal(key, (2, 4, 16, 16), dtype=jnp.float32)

    ref = _reference(x, sc)

    # fp32 path: single fused matmul, fp32 accumulation, exact fp32 weights.
    out = jax.block_until_ready(interpolate_bilinear(x, sc))
    assert out.shape == (2, 4, 32, 32), out.shape
    assert jnp.allclose(out, ref, atol=1e-5, rtol=1e-5)

    # bf16 path (MXU-native, half the HBM traffic); single matmul so no
    # intermediate double-rounding, only input/weight bf16 quantization.
    out_bf16 = jax.block_until_ready(interpolate_bilinear(x.astype(jnp.bfloat16), sc))
    assert out_bf16.shape == (2, 4, 32, 32), out_bf16.shape
    assert jnp.allclose(out_bf16.astype(jnp.float32), ref, atol=1e-1, rtol=5e-2)

    print("KERNEL_OK")
</pallas_src>

<mosaic_0001>
module attributes {stable_mosaic.version = 11 : i64} {
  func.func @_fused_kernel(%arg0: i32, %arg1: memref<256x1024xf32, #tpu.memory_space<vmem>>, %arg2: memref<8x256xf32, #tpu.memory_space<vmem>>, %arg3: memref<8x1024xf32, #tpu.memory_space<vmem>>) attributes {dimension_semantics = [#tpu.dimension_semantics<parallel>], iteration_bounds = array<i64: 1>, scalar_prefetch = 0 : i64, scratch_operands = 0 : i64, tpu.core_type = #tpu.core_type<tc>, window_params = [{pipeline_mode = #tpu.pipeline_mode<synchronous>, transform_indices = @transform_0, window_bounds = array<i64: 256, 1024>}, {transform_indices = @transform_1, window_bounds = array<i64: 8, 256>}, {transform_indices = @transform_2, window_bounds = array<i64: 8, 1024>}]} {
    %c0 = arith.constant 0 : index
    %c0_0 = arith.constant 0 : index
    %0 = vector.load %arg2[%c0, %c0_0] : memref<8x256xf32, #tpu.memory_space<vmem>>, vector<8x256xf32>
    %c0_1 = arith.constant 0 : index
    %c0_2 = arith.constant 0 : index
    %1 = vector.load %arg1[%c0_1, %c0_2] : memref<256x1024xf32, #tpu.memory_space<vmem>>, vector<256x1024xf32>
    %cst = arith.constant dense<0.000000e+00> : vector<8x1024xf32>
    %2 = tpu.matmul %0, %1, %cst {dimension_numbers = #tpu.dot_dimension_numbers<[1], [0], [0], [1], [0, 0, 1, 1], [], []>} : vector<8x256xf32>, vector<256x1024xf32>, vector<8x1024xf32> -> vector<8x1024xf32>
    %c0_3 = arith.constant 0 : index
    %c0_4 = arith.constant 0 : index
    %3 = vector.load %arg3[%c0_3, %c0_4] : memref<8x1024xf32, #tpu.memory_space<vmem>>, vector<8x1024xf32>
    tpu.vector_store %arg3[%c0_3, %c0_4], %2 {strides = array<i32>} : memref<8x1024xf32, #tpu.memory_space<vmem>>, vector<8x1024xf32>,
    return
  }
  func.func @transform_0(%arg0: i32) -> (i32, i32) {
    %c0_i32 = arith.constant 0 : i32
    %c0_i32_0 = arith.constant 0 : i32
    %c0_i32_1 = arith.constant 0 : i32
    return %c0_i32, %c0_i32_0 : i32, i32
  }
  func.func @transform_1(%arg0: i32) -> (i32, i32) {
    %c0_i32 = arith.constant 0 : i32
    %c0_i32_0 = arith.constant 0 : i32
    return %arg0, %c0_i32 : i32, i32
  }
  func.func @transform_2(%arg0: i32) -> (i32, i32) {
    %c0_i32 = arith.constant 0 : i32
    %c0_i32_0 = arith.constant 0 : i32
    return %arg0, %c0_i32 : i32, i32
  }
}

</mosaic_0001>

<bundles_post_ra>
// kernel: tpu_custom_call.1
= control target key start
LH: loop header
LB: loop body
LE: loop exit
PB: predicated region body
PF: predicated region fallthrough
CT: control target
= control target key end

     0   :  { %7 = vsyncpa [#allocation3], 0  ;;  %s1005_s0 = inlined_call_operand.hbm [shape: f32[256,1024], index: 0, kind: input, shape index: {}]   ;;  %s1006_s1 = inlined_call_operand.hbm [shape: f32[8,256], index: 1, kind: input, shape index: {}]   ;;  %s1007_s2 = inlined_call_operand.hbm [shape: f32[8,1024], index: 2, kind: output, shape index: {}]  }
   0x1   :  { %8 = vsyncpa [#allocation6], 0 }
   0x2   :  { %9 = vsyncpa [#allocation4], 0  ;;  %s937_s9 = smov [#allocation2]   ;;  %s865_s13 = scalar_lea.hbm %s1005_s0, 32768 }
   0x3   :  { %s15_s10 = sshll.u32 %s937_s9, 4  ;;  %p866_p0 = scmp.ne.s32.totalorder %s1005_s0, %s865_s13  ;;  %s16_s10 = int_to_ptr.vmem [resolvable:$true] %s15_s10 }
   0x4   :  { %p869_p1 = scmp.lt.u32.totalorder %s865_s13, %s1005_s0 }
   0x6   :  { %p871_p2 = pnand %p869_p1, %p866_p0 }
   0x8   :  { %874 = shalt.err (!%p871_p2)
}
   0x9   :  { %s875_s18 = scalar_lea.vmem %s16_s10, 32768  ;;  %p880_p4 = scmp.lt.s32.totalorder %s16_s10, %s16_s10 }
   0xa   :  { %p876_p3 = scmp.ne.s32.totalorder %s16_s10, %s875_s18  ;;  %p881_p5 = scmp.lt.s32.totalorder %s875_s18, %s875_s18 }
   0xc   :  { %p882_p6 = por %p881_p5, %p880_p4 }
   0xe   :  { %p883_p7 = pnand %p882_p6, %p876_p3 }
  0x10   :  { %886 = shalt.err (!%p883_p7)
}
  0x11   :  { %s938_s19 = smov 1024   ;;  %s939_s20 = smov 64  }
  0x12   :  { %21 = dma.hbm_to_vmem [thread:$0]  %s1005_s0, 32768, %s16_s10, [#allocation3], %s938_s19, %s938_s19, %s939_s20  }
  0x13   :  { %s940_s23 = smov [#allocation5]   ;;  %s887_s27 = scalar_lea.hbm %s1006_s1, 256 }
  0x14   :  { %s28_s24 = sshll.u32 %s940_s23, 4  ;;  %p888_p8 = scmp.ne.s32.totalorder %s1006_s1, %s887_s27  ;;  %s29_s24 = int_to_ptr.vmem [resolvable:$true] %s28_s24 }
  0x15   :  { %p891_p9 = scmp.lt.u32.totalorder %s887_s27, %s1006_s1 }
  0x17   :  { %p893_p10 = pnand %p891_p9, %p888_p8 }
  0x19   :  { %896 = shalt.err (!%p893_p10)
}
  0x1a   :  { %s897_s4 = scalar_lea.vmem %s29_s24, 256  ;;  %p902_p12 = scmp.lt.s32.totalorder %s29_s24, %s29_s24 }
  0x1b   :  { %p898_p11 = scmp.ne.s32.totalorder %s29_s24, %s897_s4  ;;  %p903_p13 = scmp.lt.s32.totalorder %s897_s4, %s897_s4 }
  0x1d   :  { %p904_p0 = por %p903_p13, %p902_p12 }
  0x1f   :  { %p905_p1 = pnand %p904_p0, %p898_p11 }
  0x21   :  { %908 = shalt.err (!%p905_p1)
}
  0x22   :  { %31 = dma.hbm_to_vmem [thread:$0]  %s1006_s1, 256, %s29_s24, [#allocation6]  }
  0x23   :  { %931 = dma.done.wait [#allocation3], 32768  }
  0x24   :  { %932 = vsyncadd [#allocation3], 4294934528 }
  0x25   :  { %933 = dma.done.wait [#allocation6], 256  }
  0x26   :  { %934 = vsyncadd [#allocation6], 4294967040  ;;  %v41_v0 = vld [vmem:[#allocation2 + $0x8] sm:$0xff]  ;;  %v43_v2 = vld [vmem:[#allocation2 + $0x18] sm:$0xff]  ;;  %s941_s1 = smov [#allocation7]  }
  0x27   :  { %v49_v1 = vld [vmem:[#allocation2 + $0x48] sm:$0xff]  ;;  %v51_v4 = vld [vmem:[#allocation2 + $0x58] sm:$0xff]  ;;  %v40_v5 = vld [vmem:[#allocation2] sm:$0xff]  ;;  %s594_s6 = sshll.u32 %s941_s1, 4  ;;  %s595_s6 = int_to_ptr.vmem [resolvable:$true] %s594_s6 }
  0x28   :  { %v604_v3 = vpack.c.bf16 %v49_v1, %v41_v0  ;;  %v48_v6 = vld [vmem:[#allocation2 + $0x40] sm:$0xff]  ;;  %v668_v7 = vpack.c.bf16 %v51_v4, %v43_v2  ;;  %v42_v9 = vld [vmem:[#allocation2 + $0x10] sm:$0xff]  ;;  %v57_v11 = vld [vmem:[#allocation2 + $0x88] sm:$0xff]  ;;  %s909_s7 = scalar_lea.vmem %s595_s6, 1024  ;;  %p914_p3 = scmp.lt.s32.totalorder %s595_s6, %s595_s6 }
  0x29   :  { %v606_v8 = vpack.c.bf16 %v48_v6, %v40_v5  ;;  %v50_v10 = vld [vmem:[#allocation2 + $0x50] sm:$0xff]  ;;  %v65_v13 = vld [vmem:[#allocation2 + $0xc8] sm:$0xff]  ;;  %v59_v14 = vld [vmem:[#allocation2 + $0x98] sm:$0xff]  ;;  %p910_p2 = scmp.ne.s32.totalorder %s595_s6, %s909_s7  ;;  %p915_p4 = scmp.lt.s32.totalorder %s909_s7, %s909_s7 }
  0x2a   :  { %605 = vmatprep.subr.bf16.mxu0 %v604_v3  ;;  %v670_v12 = vpack.c.bf16 %v50_v10, %v42_v9  ;;  %v67_v15 = vld [vmem:[#allocation2 + $0xd8] sm:$0xff]  ;;  %669 = vmatprep.subr.bf16.mxu1 %v668_v7  ;;  %v608_v16 = vpack.c.bf16 %v65_v13, %v57_v11  ;;  %v56_v18 = vld [vmem:[#allocation2 + $0x80] sm:$0xff]  ;;  %v58_v20 = vld [vmem:[#allocation2 + $0x90] sm:$0xff] }
  0x2b   :  { %607 = vmatpush1.bf16.msra.mxu0 %v606_v8  ;;  %v672_v17 = vpack.c.bf16 %v67_v15, %v59_v14  ;;  %v64_v19 = vld [vmem:[#allocation2 + $0xc0] sm:$0xff]  ;;  %v66_v22 = vld [vmem:[#allocation2 + $0xd0] sm:$0xff]  ;;  %v73_v23 = vld [vmem:[#allocation2 + $0x108] sm:$0xff]  ;;  %p916_p5 = por %p915_p4, %p914_p3 }
  0x2c   :  { %671 = vmatpush1.bf16.msra.mxu1 %v670_v12  ;;  %v610_v21 = vpack.c.bf16 %v64_v19, %v56_v18  ;;  %v81_v24 = vld [vmem:[#allocation2 + $0x148] sm:$0xff]  ;;  %609 = vmatprep.subr.bf16.mxu0 %v608_v16  ;;  %v674_v25 = vpack.c.bf16 %v66_v22, %v58_v20  ;;  %v75_v27 = vld [vmem:[#allocation2 + $0x118] sm:$0xff]  ;;  %v72_v29 = vld [vmem:[#allocation2 + $0x100] sm:$0xff] }
  0x2d   :  { %673 = vmatprep.subr.bf16.mxu1 %v672_v17  ;;  %v612_v26 = vpack.c.bf16 %v81_v24, %v73_v23  ;;  %v83_v28 = vld [vmem:[#allocation2 + $0x158] sm:$0xff]  ;;  %v80_v31 = vld [vmem:[#allocation2 + $0x140] sm:$0xff]  ;;  %v74_v32 = vld [vmem:[#allocation2 + $0x110] sm:$0xff]  ;;  %p917_p6 = pnand %p916_p5, %p910_p2 }
  0x2e   :  { %v676_v30 = vpack.c.bf16 %v83_v28, %v75_v27  ;;  %v82_v33 = vld [vmem:[#allocation2 + $0x150] sm:$0xff]  ;;  %v614_v34 = vpack.c.bf16 %v80_v31, %v72_v29  ;;  %v89_v35 = vld [vmem:[#allocation2 + $0x188] sm:$0xff]  ;;  %v91_v37 = vld [vmem:[#allocation2 + $0x198] sm:$0xff] }
  0x2f   :  { %611 = vmatpush1.bf16.msra.mxu0 %v610_v21  ;;  %v97_v36 = vld [vmem:[#allocation2 + $0x1c8] sm:$0xff]  ;;  %v678_v38 = vpack.c.bf16 %v82_v33, %v74_v32  ;;  %v99_v40 = vld [vmem:[#allocation2 + $0x1d8] sm:$0xff]  ;;  %v88_v41 = vld [vmem:[#allocation2 + $0x180] sm:$0xff] }
  0x30   :  { %675 = vmatpush1.bf16.msra.mxu1 %v674_v25  ;;  %613 = vmatprep.subr.bf16.mxu0 %v612_v26  ;;  %v616_v39 = vpack.c.bf16 %v97_v36, %v89_v35  ;;  %v96_v42 = vld [vmem:[#allocation2 + $0x1c0] sm:$0xff]  ;;  %v680_v43 = vpack.c.bf16 %v99_v40, %v91_v37  ;;  %v90_v44 = vld [vmem:[#allocation2 + $0x190] sm:$0xff]  ;;  %v105_v46 = vld [vmem:[#allocation2 + $0x208] sm:$0xff] }
  0x31   :  { %677 = vmatprep.subr.bf16.mxu1 %v676_v30  ;;  %v98_v45 = vld [vmem:[#allocation2 + $0x1d0] sm:$0xff]  ;;  %v113_v47 = vld [vmem:[#allocation2 + $0x248] sm:$0xff]  ;;  %v107_v48 = vld [vmem:[#allocation2 + $0x218] sm:$0xff]  ;;  %v618_v50 = vpack.c.bf16 %v96_v42, %v88_v41 }
  0x32   :  { %v115_v49 = vld [vmem:[#allocation2 + $0x258] sm:$0xff]  ;;  %v682_v51 = vpack.c.bf16 %v98_v45, %v90_v44  ;;  %v620_v52 = vpack.c.bf16 %v113_v47, %v105_v46  ;;  %v104_v53 = vld [vmem:[#allocation2 + $0x200] sm:$0xff]  ;;  %v106_v55 = vld [vmem:[#allocation2 + $0x210] sm:$0xff] }
  0x33   :  { %615 = vmatpush1.bf16.msra.mxu0 %v614_v34  ;;  %v112_v54 = vld [vmem:[#allocation2 + $0x240] sm:$0xff]  ;;  %v684_v56 = vpack.c.bf16 %v115_v49, %v107_v48  ;;  %v114_v57 = vld [vmem:[#allocation2 + $0x250] sm:$0xff]  ;;  %v121_v58 = vld [vmem:[#allocation2 + $0x288] sm:$0xff] }
  0x34   :  { %679 = vmatpush1.bf16.msra.mxu1 %v678_v38  ;;  %617 = vmatprep.subr.bf16.mxu0 %v616_v39  ;;  %v129_v59 = vld [vmem:[#allocation2 + $0x2c8] sm:$0xff]  ;;  %v123_v60 = vld [vmem:[#allocation2 + $0x298] sm:$0xff]  ;;  %v622_v62 = vpack.c.bf16 %v112_v54, %v104_v53  ;;  %v686_v63 = vpack.c.bf16 %v114_v57, %v106_v55  ;;  %v120_v1 = vld [vmem:[#allocation2 + $0x280] sm:$0xff] }
  0x35   :  { %681 = vmatprep.subr.bf16.mxu1 %v680_v43  ;;  %v131_v61 = vld [vmem:[#allocation2 + $0x2d8] sm:$0xff]  ;;  %v624_v0 = vpack.c.bf16 %v129_v59, %v121_v58  ;;  %v128_v2 = vld [vmem:[#allocation2 + $0x2c0] sm:$0xff]  ;;  %v122_v3 = vld [vmem:[#allocation2 + $0x290] sm:$0xff] }
  0x36   :  { %v688_v4 = vpack.c.bf16 %v131_v61, %v123_v60  ;;  %v130_v5 = vld [vmem:[#allocation2 + $0x2d0] sm:$0xff]  ;;  %v137_v6 = vld [vmem:[#allocation2 + $0x308] sm:$0xff]  ;;  %v139_v8 = vld [vmem:[#allocation2 + $0x318] sm:$0xff]  ;;  %v626_v10 = vpack.c.bf16 %v128_v2, %v120_v1 }
  0x37   :  { %619 = vmatpush1.bf16.msra.mxu0 %v618_v50  ;;  %v145_v7 = vld [vmem:[#allocation2 + $0x348] sm:$0xff]  ;;  %v147_v9 = vld [vmem:[#allocation2 + $0x358] sm:$0xff]  ;;  %v690_v11 = vpack.c.bf16 %v130_v5, %v122_v3  ;;  %v136_v13 = vld [vmem:[#allocation2 + $0x300] sm:$0xff] }
  0x38   :  { %683 = vmatpush1.bf16.msra.mxu1 %v682_v51  ;;  %621 = vmatprep.subr.bf16.mxu0 %v620_v52  ;;  %v628_v12 = vpack.c.bf16 %v145_v7, %v137_v6  ;;  %v144_v14 = vld [vmem:[#allocation2 + $0x340] sm:$0xff]  ;;  %v138_v15 = vld [vmem:[#allocation2 + $0x310] sm:$0xff]  ;;  %v692_v16 = vpack.c.bf16 %v147_v9, %v139_v8  ;;  %v153_v18 = vld [vmem:[#allocation2 + $0x388] sm:$0xff] }
  0x39   :  { %685 = vmatprep.subr.bf16.mxu1 %v684_v56  ;;  %v146_v17 = vld [vmem:[#allocation2 + $0x350] sm:$0xff]  ;;  %v161_v19 = vld [vmem:[#allocation2 + $0x3c8] sm:$0xff]  ;;  %v155_v20 = vld [vmem:[#allocation2 + $0x398] sm:$0xff]  ;;  %v630_v22 = vpack.c.bf16 %v144_v14, %v136_v13 }
  0x3a   :  { %v163_v21 = vld [vmem:[#allocation2 + $0x3d8] sm:$0xff]  ;;  %v694_v23 = vpack.c.bf16 %v146_v17, %v138_v15  ;;  %v632_v24 = vpack.c.bf16 %v161_v19, %v153_v18  ;;  %v152_v25 = vld [vmem:[#allocation2 + $0x380] sm:$0xff]  ;;  %v154_v27 = vld [vmem:[#allocation2 + $0x390] sm:$0xff] }
  0x3b   :  { %623 = vmatpush1.bf16.msra.mxu0 %v622_v62  ;;  %v160_v26 = vld [vmem:[#allocation2 + $0x3c0] sm:$0xff]  ;;  %v696_v28 = vpack.c.bf16 %v163_v21, %v155_v20  ;;  %v162_v29 = vld [vmem:[#allocation2 + $0x3d0] sm:$0xff]  ;;  %v169_v30 = vld [vmem:[#allocation2 + $0x408] sm:$0xff] }
  0x3c   :  { %687 = vmatpush1.bf16.msra.mxu1 %v686_v63  ;;  %625 = vmatprep.subr.bf16.mxu0 %v624_v0  ;;  %v177_v31 = vld [vmem:[#allocation2 + $0x448] sm:$0xff]  ;;  %v171_v32 = vld [vmem:[#allocation2 + $0x418] sm:$0xff]  ;;  %v634_v34 = vpack.c.bf16 %v160_v26, %v152_v25  ;;  %v698_v35 = vpack.c.bf16 %v162_v29, %v154_v27  ;;  %v168_v37 = vld [vmem:[#allocation2 + $0x400] sm:$0xff] }
  0x3d   :  { %689 = vmatprep.subr.bf16.mxu1 %v688_v4  ;;  %v179_v33 = vld [vmem:[#allocation2 + $0x458] sm:$0xff]  ;;  %v636_v36 = vpack.c.bf16 %v177_v31, %v169_v30  ;;  %v176_v38 = vld [vmem:[#allocation2 + $0x440] sm:$0xff]  ;;  %v170_v39 = vld [vmem:[#allocation2 + $0x410] sm:$0xff] }
  0x3e   :  { %v700_v40 = vpack.c.bf16 %v179_v33, %v171_v32  ;;  %v178_v41 = vld [vmem:[#allocation2 + $0x450] sm:$0xff]  ;;  %v185_v42 = vld [vmem:[#allocation2 + $0x488] sm:$0xff]  ;;  %v187_v44 = vld [vmem:[#allocation2 + $0x498] sm:$0xff]  ;;  %v638_v46 = vpack.c.bf16 %v176_v38, %v168_v37 }
  0x3f   :  { %627 = vmatpush1.bf16.msra.mxu0 %v626_v10  ;;  %v193_v43 = vld [vmem:[#allocation2 + $0x4c8] sm:$0xff]  ;;  %v195_v45 = vld [vmem:[#allocation2 + $0x4d8] sm:$0xff]  ;;  %v702_v47 = vpack.c.bf16 %v178_v41, %v170_v39  ;;  %v184_v49 = vld [vmem:[#allocation2 + $0x480] sm:$0xff] }
  0x40   :  { %691 = vmatpush1.bf16.msra.mxu1 %v690_v11  ;;  %629 = vmatprep.subr.bf16.mxu0 %v628_v12  ;;  %v640_v48 = vpack.c.bf16 %v193_v43, %v185_v42  ;;  %v192_v50 = vld [vmem:[#allocation2 + $0x4c0] sm:$0xff]  ;;  %v186_v51 = vld [vmem:[#allocation2 + $0x490] sm:$0xff]  ;;  %v704_v52 = vpack.c.bf16 %v195_v45, %v187_v44  ;;  %v201_v54 = vld [vmem:[#allocation2 + $0x508] sm:$0xff] }
  0x41   :  { %693 = vmatprep.subr.bf16.mxu1 %v692_v16  ;;  %v194_v53 = vld [vmem:[#allocation2 + $0x4d0] sm:$0xff]  ;;  %v209_v55 = vld [vmem:[#allocation2 + $0x548] sm:$0xff]  ;;  %v203_v56 = vld [vmem:[#allocation2 + $0x518] sm:$0xff]  ;;  %v642_v58 = vpack.c.bf16 %v192_v50, %v184_v49 }
  0x42   :  { %v211_v57 = vld [vmem:[#allocation2 + $0x558] sm:$0xff]  ;;  %v706_v59 = vpack.c.bf16 %v194_v53, %v186_v51  ;;  %v644_v60 = vpack.c.bf16 %v209_v55, %v201_v54  ;;  %v200_v61 = vld [vmem:[#allocation2 + $0x500] sm:$0xff]  ;;  %v202_v63 = vld [vmem:[#allocation2 + $0x510] sm:$0xff] }
  0x43   :  { %631 = vmatpush1.bf16.msra.mxu0 %v630_v22  ;;  %v208_v62 = vld [vmem:[#allocation2 + $0x540] sm:$0xff]  ;;  %v708_v0 = vpack.c.bf16 %v211_v57, %v203_v56  ;;  %v210_v1 = vld [vmem:[#allocation2 + $0x550] sm:$0xff]  ;;  %v217_v2 = vld [vmem:[#allocation2 + $0x588] sm:$0xff] }
  0x44   :  { %695 = vmatpush1.bf16.msra.mxu1 %v694_v23  ;;  %633 = vmatprep.subr.bf16.mxu0 %v632_v24  ;;  %v225_v3 = vld [vmem:[#allocation2 + $0x5c8] sm:$0xff]  ;;  %v219_v4 = vld [vmem:[#allocation2 + $0x598] sm:$0xff]  ;;  %v646_v6 = vpack.c.bf16 %v208_v62, %v200_v61  ;;  %v216_v7 = vld [vmem:[#allocation2 + $0x580] sm:$0xff]  ;;  %v710_v8 = vpack.c.bf16 %v210_v1, %v202_v63 }
  0x45   :  { %697 = vmatprep.subr.bf16.mxu1 %v696_v28  ;;  %v227_v5 = vld [vmem:[#allocation2 + $0x5d8] sm:$0xff]  ;;  %v648_v9 = vpack.c.bf16 %v225_v3, %v217_v2  ;;  %v224_v10 = vld [vmem:[#allocation2 + $0x5c0] sm:$0xff]  ;;  %v218_v11 = vld [vmem:[#allocation2 + $0x590] sm:$0xff] }
  0x46   :  { %v226_v12 = vld [vmem:[#allocation2 + $0x5d0] sm:$0xff]  ;;  %v712_v13 = vpack.c.bf16 %v227_v5, %v219_v4  ;;  %v233_v14 = vld [vmem:[#allocation2 + $0x608] sm:$0xff]  ;;  %v235_v17 = vld [vmem:[#allocation2 + $0x618] sm:$0xff]  ;;  %v650_v19 = vpack.c.bf16 %v224_v10, %v216_v7 }
  0x47   :  { %635 = vmatpush1.bf16.msra.mxu0 %v634_v34  ;;  %v241_v15 = vld [vmem:[#allocation2 + $0x648] sm:$0xff]  ;;  %v243_v18 = vld [vmem:[#allocation2 + $0x658] sm:$0xff]  ;;  %v714_v20 = vpack.c.bf16 %v226_v12, %v218_v11  ;;  %v232_v22 = vld [vmem:[#allocation2 + $0x600] sm:$0xff] }
  0x48   :  { %699 = vmatpush1.bf16.msra.mxu1 %v698_v35  ;;  %637 = vmatprep.subr.bf16.mxu0 %v636_v36  ;;  %v981_v16 = vld [vmem:[#allocation5 + $0x8] sm:$0xff]  ;;  %v652_v21 = vpack.c.bf16 %v241_v15, %v233_v14  ;;  %v240_v23 = vld [vmem:[#allocation2 + $0x640] sm:$0xff]  ;;  %v234_v24 = vld [vmem:[#allocation2 + $0x610] sm:$0xff]  ;;  %v716_v25 = vpack.c.bf16 %v243_v18, %v235_v17 }
  0x49   :  { %701 = vmatprep.subr.bf16.mxu1 %v700_v40  ;;  %360 = vmatprep.mubr.f32.mxu0 %v981_v16  ;;  %v242_v26 = vld [vmem:[#allocation2 + $0x650] sm:$0xff]  ;;  %v249_v27 = vld [vmem:[#allocation2 + $0x688] sm:$0xff]  ;;  %v251_v29 = vld [vmem:[#allocation2 + $0x698] sm:$0xff]  ;;  %v654_v31 = vpack.c.bf16 %v240_v23, %v232_v22 }
  0x4a   :  { %431 = vmatprep.mubr.f32.mxu1 %v981_v16  ;;  %v257_v28 = vld [vmem:[#allocation2 + $0x6c8] sm:$0xff]  ;;  %v259_v30 = vld [vmem:[#allocation2 + $0x6d8] sm:$0xff]  ;;  %v718_v32 = vpack.c.bf16 %v242_v26, %v234_v24  ;;  %v248_v34 = vld [vmem:[#allocation2 + $0x680] sm:$0xff] }
  0x4b   :  { %639 = vmatpush1.bf16.msra.mxu0 %v638_v46  ;;  %v656_v33 = vpack.c.bf16 %v257_v28, %v249_v27  ;;  %v256_v35 = vld [vmem:[#allocation2 + $0x6c0] sm:$0xff]  ;;  %v250_v36 = vld [vmem:[#allocation2 + $0x690] sm:$0xff]  ;;  %v720_v37 = vpack.c.bf16 %v259_v30, %v251_v29  ;;  %v265_v39 = vld [vmem:[#allocation2 + $0x708] sm:$0xff] }
  0x4c   :  { %703 = vmatpush1.bf16.msra.mxu1 %v702_v47  ;;  %641 = vmatprep.subr.bf16.mxu0 %v640_v48  ;;  %v258_v38 = vld [vmem:[#allocation2 + $0x6d0] sm:$0xff]  ;;  %v273_v40 = vld [vmem:[#allocation2 + $0x748] sm:$0xff]  ;;  %v267_v41 = vld [vmem:[#allocation2 + $0x718] sm:$0xff]  ;;  %v658_v43 = vpack.c.bf16 %v256_v35, %v248_v34 }
  0x4d   :  { %705 = vmatprep.subr.bf16.mxu1 %v704_v52  ;;  %v275_v42 = vld [vmem:[#allocation2 + $0x758] sm:$0xff]  ;;  %v722_v44 = vpack.c.bf16 %v258_v38, %v250_v36  ;;  %v660_v45 = vpack.c.bf16 %v273_v40, %v265_v39  ;;  %v264_v46 = vld [vmem:[#allocation2 + $0x700] sm:$0xff]  ;;  %v266_v48 = vld [vmem:[#allocation2 + $0x710] sm:$0xff] }
  0x4e   :  { %v272_v47 = vld [vmem:[#allocation2 + $0x740] sm:$0xff]  ;;  %v724_v49 = vpack.c.bf16 %v275_v42, %v267_v41  ;;  %v274_v50 = vld [vmem:[#allocation2 + $0x750] sm:$0xff]  ;;  %v281_v51 = vld [vmem:[#allocation2 + $0x788] sm:$0xff] }
  0x4f   :  { %643 = vmatpush1.bf16.msra.mxu0 %v642_v58  ;;  %v289_v52 = vld [vmem:[#allocation2 + $0x7c8] sm:$0xff]  ;;  %v283_v53 = vld [vmem:[#allocation2 + $0x798] sm:$0xff]  ;;  %v662_v55 = vpack.c.bf16 %v272_v47, %v264_v46  ;;  %v726_v56 = vpack.c.bf16 %v274_v50, %v266_v48  ;;  %v280_v58 = vld [vmem:[#allocation2 + $0x780] sm:$0xff] }
  0x50   :  { %707 = vmatpush1.bf16.msra.mxu1 %v706_v59  ;;  %645 = vmatprep.subr.bf16.mxu0 %v644_v60  ;;  %v291_v54 = vld [vmem:[#allocation2 + $0x7d8] sm:$0xff]  ;;  %v664_v57 = vpack.c.bf16 %v289_v52, %v281_v51  ;;  %v288_v59 = vld [vmem:[#allocation2 + $0x7c0] sm:$0xff]  ;;  %v282_v60 = vld [vmem:[#allocation2 + $0x790] sm:$0xff] }
  0x51   :  { %709 = vmatprep.subr.bf16.mxu1 %v708_v0  ;;  %v728_v61 = vpack.c.bf16 %v291_v54, %v283_v53  ;;  %v290_v62 = vld [vmem:[#allocation2 + $0x7d0] sm:$0xff]  ;;  %v45_v63 = vld [vmem:[#allocation2 + $0x28] sm:$0xff]  ;;  %v47_v1 = vld [vmem:[#allocation2 + $0x38] sm:$0xff]  ;;  %v666_v3 = vpack.c.bf16 %v288_v59, %v280_v58 }
  0x52   :  { %v53_v0 = vld [vmem:[#allocation2 + $0x68] sm:$0xff]  ;;  %v55_v2 = vld [vmem:[#allocation2 + $0x78] sm:$0xff]  ;;  %v730_v4 = vpack.c.bf16 %v290_v62, %v282_v60  ;;  %v52_v7 = vld [vmem:[#allocation2 + $0x60] sm:$0xff] }
  0x53   :  { %647 = vmatpush1.bf16.msra.mxu0 %v646_v6  ;;  %v732_v5 = vpack.c.bf16 %v53_v0, %v45_v63  ;;  %v44_v6 = vld [vmem:[#allocation2 + $0x20] sm:$0xff]  ;;  %v54_v10 = vld [vmem:[#allocation2 + $0x70] sm:$0xff]  ;;  %v61_v11 = vld [vmem:[#allocation2 + $0xa8] sm:$0xff] }
  0x54   :  { %711 = vmatpush1.bf16.msra.mxu1 %v710_v8  ;;  %649 = vmatprep.subr.bf16.mxu0 %v648_v9  ;;  %v46_v8 = vld [vmem:[#allocation2 + $0x30] sm:$0xff]  ;;  %v796_v9 = vpack.c.bf16 %v55_v2, %v47_v1  ;;  %v69_v12 = vld [vmem:[#allocation2 + $0xe8] sm:$0xff]  ;;  %v71_v14 = vld [vmem:[#allocation2 + $0xf8] sm:$0xff]  ;;  %v734_v17 = vpack.c.bf16 %v52_v7, %v44_v6 }
  0x55   :  { %713 = vmatprep.subr.bf16.mxu1 %v712_v13  ;;  %v63_v13 = vld [vmem:[#allocation2 + $0xb8] sm:$0xff]  ;;  %v985_v15 = vld [vmem:[#allocation5] sm:$0xff]  ;;  %v798_v18 = vpack.c.bf16 %v54_v10, %v46_v8  ;;  %v62_v22 = vld [vmem:[#allocation2 + $0xb0] sm:$0xff] }
  0x56   :  { %v800_v23 = vpack.c.bf16 %v71_v14, %v63_v13  ;;  %v70_v24 = vld [vmem:[#allocation2 + $0xf0] sm:$0xff]  ;;  %v85_v26 = vld [vmem:[#allocation2 + $0x168] sm:$0xff]  ;;  %v79_v27 = vld [vmem:[#allocation2 + $0x138] sm:$0xff] }
  0x57   :  { %651 = vmatpush1.bf16.msra.mxu0 %v650_v19  ;;  %v736_v19 = vpack.c.bf16 %v69_v12, %v61_v11  ;;  %v87_v28 = vld [vmem:[#allocation2 + $0x178] sm:$0xff]  ;;  %v802_v30 = vpack.c.bf16 %v70_v24, %v62_v22  ;;  %v78_v34 = vld [vmem:[#allocation2 + $0x130] sm:$0xff]  ;;  %v101_v38 = vld [vmem:[#allocation2 + $0x1e8] sm:$0xff] }
  0x58   :  { %715 = vmatpush1.bf16.msra.mxu1 %v714_v20  ;;  %653 = vmatprep.subr.bf16.mxu0 %v652_v21  ;;  %v60_v20 = vld [vmem:[#allocation2 + $0xa0] sm:$0xff]  ;;  %v804_v35 = vpack.c.bf16 %v87_v28, %v79_v27  ;;  %v86_v36 = vld [vmem:[#allocation2 + $0x170] sm:$0xff]  ;;  %v95_v39 = vld [vmem:[#allocation2 + $0x1b8] sm:$0xff] }
  0x59   :  { %717 = vmatprep.subr.bf16.mxu1 %v716_v25  ;;  %v68_v21 = vld [vmem:[#allocation2 + $0xe0] sm:$0xff]  ;;  %v77_v25 = vld [vmem:[#allocation2 + $0x128] sm:$0xff]  ;;  %v103_v40 = vld [vmem:[#allocation2 + $0x1f8] sm:$0xff]  ;;  %v806_v42 = vpack.c.bf16 %v86_v36, %v78_v34 }
  0x5a   :  { %v738_v29 = vpack.c.bf16 %v68_v21, %v60_v20  ;;  %v94_v46 = vld [vmem:[#allocation2 + $0x1b0] sm:$0xff]  ;;  %v808_v47 = vpack.c.bf16 %v103_v40, %v95_v39  ;;  %v117_v50 = vld [vmem:[#allocation2 + $0x268] sm:$0xff]  ;;  %v111_v51 = vld [vmem:[#allocation2 + $0x238] sm:$0xff] }
  0x5b   :  { %655 = vmatpush1.bf16.msra.mxu0 %v654_v31  ;;  %v740_v31 = vpack.c.bf16 %v85_v26, %v77_v25  ;;  %v102_v48 = vld [vmem:[#allocation2 + $0x1f0] sm:$0xff]  ;;  %v119_v52 = vld [vmem:[#allocation2 + $0x278] sm:$0xff]  ;;  %v125_v60 = vld [vmem:[#allocation2 + $0x2a8] sm:$0xff] }
  0x5c   :  { %719 = vmatpush1.bf16.msra.mxu1 %v718_v32  ;;  %657 = vmatprep.subr.bf16.mxu0 %v656_v33  ;;  %v76_v32 = vld [vmem:[#allocation2 + $0x120] sm:$0xff]  ;;  %v812_v58 = vpack.c.bf16 %v119_v52, %v111_v51  ;;  %v118_v59 = vld [vmem:[#allocation2 + $0x270] sm:$0xff]  ;;  %v127_v62 = vld [vmem:[#allocation2 + $0x2b8] sm:$0xff] }
  0x5d   :  { %721 = vmatprep.subr.bf16.mxu1 %v720_v37  ;;  %v84_v33 = vld [vmem:[#allocation2 + $0x160] sm:$0xff]  ;;  %v93_v37 = vld [vmem:[#allocation2 + $0x1a8] sm:$0xff]  ;;  %v135_v63 = vld [vmem:[#allocation2 + $0x2f8] sm:$0xff] }
  0x5e   :  { %v742_v41 = vpack.c.bf16 %v84_v33, %v76_v32  ;;  %v816_v6 = vpack.c.bf16 %v135_v63, %v127_v62  ;;  %v134_v7 = vld [vmem:[#allocation2 + $0x2f0] sm:$0xff]  ;;  %v141_v8 = vld [vmem:[#allocation2 + $0x328] sm:$0xff]  ;;  %v143_v10 = vld [vmem:[#allocation2 + $0x338] sm:$0xff] }
  0x5f   :  { %659 = vmatpush1.bf16.msra.mxu0 %v658_v43  ;;  %v744_v43 = vpack.c.bf16 %v101_v38, %v93_v37  ;;  %v151_v11 = vld [vmem:[#allocation2 + $0x378] sm:$0xff]  ;;  %v150_v21 = vld [vmem:[#allocation2 + $0x370] sm:$0xff]  ;;  %v157_v22 = vld [vmem:[#allocation2 + $0x3a8] sm:$0xff] }
  0x60   :  { %723 = vmatpush1.bf16.msra.mxu1 %v722_v44  ;;  %661 = vmatprep.subr.bf16.mxu0 %v660_v45  ;;  %v92_v44 = vld [vmem:[#allocation2 + $0x1a0] sm:$0xff]  ;;  %v820_v20 = vpack.c.bf16 %v151_v11, %v143_v10  ;;  %v159_v24 = vld [vmem:[#allocation2 + $0x3b8] sm:$0xff]  ;;  %v166_v33 = vld [vmem:[#allocation2 + $0x3f0] sm:$0xff] }
  0x61   :  { %725 = vmatprep.subr.bf16.mxu1 %v724_v49  ;;  %v100_v45 = vld [vmem:[#allocation2 + $0x1e0] sm:$0xff]  ;;  %v109_v49 = vld [vmem:[#allocation2 + $0x228] sm:$0xff]  ;;  %v167_v25 = vld [vmem:[#allocation2 + $0x3f8] sm:$0xff] }
  0x62   :  { %v746_v53 = vpack.c.bf16 %v100_v45, %v92_v44  ;;  %v748_v54 = vpack.c.bf16 %v117_v50, %v109_v49  ;;  %v824_v32 = vpack.c.bf16 %v167_v25, %v159_v24  ;;  %v173_v34 = vld [vmem:[#allocation2 + $0x428] sm:$0xff]  ;;  %v175_v36 = vld [vmem:[#allocation2 + $0x438] sm:$0xff]  ;;  %v182_v45 = vld [vmem:[#allocation2 + $0x470] sm:$0xff] }
  0x63   :  { %663 = vmatpush1.bf16.msra.mxu0 %v662_v55  ;;  %v108_v55 = vld [vmem:[#allocation2 + $0x220] sm:$0xff]  ;;  %v183_v37 = vld [vmem:[#allocation2 + $0x478] sm:$0xff] }
  0x64   :  { %727 = vmatpush1.bf16.msra.mxu1 %v726_v56  ;;  %665 = vmatprep.subr.bf16.mxu0 %v664_v57  ;;  %v116_v56 = vld [vmem:[#allocation2 + $0x260] sm:$0xff]  ;;  %v110_v57 = vld [vmem:[#allocation2 + $0x230] sm:$0xff]  ;;  %v828_v44 = vpack.c.bf16 %v183_v37, %v175_v36  ;;  %v199_v49 = vld [vmem:[#allocation2 + $0x4f8] sm:$0xff] }
  0x65   :  { %729 = vmatprep.subr.bf16.mxu1 %v728_v61  ;;  %v133_v61 = vld [vmem:[#allocation2 + $0x2e8] sm:$0xff]  ;;  %v750_v0 = vpack.c.bf16 %v116_v56, %v108_v55  ;;  %v814_v1 = vpack.c.bf16 %v118_v59, %v110_v57  ;;  %v198_v56 = vld [vmem:[#allocation2 + $0x4f0] sm:$0xff]  ;;  %v207_v59 = vld [vmem:[#allocation2 + $0x538] sm:$0xff] }
  0x66   :  { %v752_v2 = vpack.c.bf16 %v133_v61, %v125_v60  ;;  %v205_v57 = vld [vmem:[#allocation2 + $0x528] sm:$0xff]  ;;  %v215_v60 = vld [vmem:[#allocation2 + $0x578] sm:$0xff] }
  0x67   :  { %667 = vmatpush1.bf16.msra.mxu0 %v666_v3  ;;  %v124_v3 = vld [vmem:[#allocation2 + $0x2a0] sm:$0xff] }
  0x68   :  { %731 = vmatpush1.bf16.msra.mxu1 %v730_v4  ;;  %733 = vmatprep.subr.bf16.mxu0 %v732_v5  ;;  %v132_v4 = vld [vmem:[#allocation2 + $0x2e0] sm:$0xff]  ;;  %v126_v5 = vld [vmem:[#allocation2 + $0x2b0] sm:$0xff] }
  0x69   :  { %797 = vmatprep.subr.bf16.mxu1 %v796_v9  ;;  %v149_v9 = vld [vmem:[#allocation2 + $0x368] sm:$0xff]  ;;  %v754_v12 = vpack.c.bf16 %v132_v4, %v124_v3  ;;  %v818_v13 = vpack.c.bf16 %v134_v7, %v126_v5  ;;  %v836_v3 = vpack.c.bf16 %v215_v60, %v207_v59  ;;  %v214_v4 = vld [vmem:[#allocation2 + $0x570] sm:$0xff]  ;;  %v223_v7 = vld [vmem:[#allocation2 + $0x5b8] sm:$0xff] }
  0x6a   :  { %361 = vmatmul.mubr.f32.vlgmr.msra.gmra.mrb[0].mxu0 %v985_v15  ;;  %v756_v14 = vpack.c.bf16 %v149_v9, %v141_v8  ;;  %v221_v5 = vld [vmem:[#allocation2 + $0x5a8] sm:$0xff]  ;;  %v231_v8 = vld [vmem:[#allocation2 + $0x5f8] sm:$0xff] }
  0x6b   :  { %432 = vmatmul.mubr.f32.vlgmr.msra.gmra.mrb[0].mxu1 %v985_v15  ;;  %735 = vmatpush1.bf16.msra.mxu0 %v734_v17  ;;  %v140_v17 = vld [vmem:[#allocation2 + $0x320] sm:$0xff] }
  0x6c   :  { %799 = vmatpush1.bf16.msra.mxu1 %v798_v18  ;;  %737 = vmatprep.subr.bf16.mxu0 %v736_v19  ;;  %v148_v18 = vld [vmem:[#allocation2 + $0x360] sm:$0xff]  ;;  %v142_v19 = vld [vmem:[#allocation2 + $0x330] sm:$0xff] }
  0x6d   :  { %801 = vmatprep.subr.bf16.mxu1 %v800_v23  ;;  %502 = vmatprep.mubr.f32.mxu0 %v981_v16  ;;  %v165_v23 = vld [vmem:[#allocation2 + $0x3e8] sm:$0xff]  ;;  %v758_v26 = vpack.c.bf16 %v148_v18, %v140_v17  ;;  %v822_v27 = vpack.c.bf16 %v150_v21, %v142_v19  ;;  %v840_v17 = vpack.c.bf16 %v231_v8, %v223_v7  ;;  %v230_v18 = vld [vmem:[#allocation2 + $0x5f0] sm:$0xff]  ;;  %v239_v21 = vld [vmem:[#allocation2 + $0x638] sm:$0xff] }
  0x6e   :  { %573 = vmatprep.mubr.f32.mxu1 %v981_v16  ;;  %v810_v16 = vpack.c.bf16 %v102_v48, %v94_v46  ;;  %v760_v28 = vpack.c.bf16 %v165_v23, %v157_v22  ;;  %v189_v46 = vld [vmem:[#allocation2 + $0x4a8] sm:$0xff]  ;;  %v191_v48 = vld [vmem:[#allocation2 + $0x4b8] sm:$0xff] }
  0x6f   :  { %739 = vmatpush1.bf16.msra.mxu0 %v738_v29  ;;  %v156_v29 = vld [vmem:[#allocation2 + $0x3a0] sm:$0xff]  ;;  %v832_v55 = vpack.c.bf16 %v199_v49, %v191_v48  ;;  %v237_v19 = vld [vmem:[#allocation2 + $0x628] sm:$0xff]  ;;  %v247_v22 = vld [vmem:[#allocation2 + $0x678] sm:$0xff] }
  0x70   :  { %803 = vmatpush1.bf16.msra.mxu1 %v802_v30  ;;  %741 = vmatprep.subr.bf16.mxu0 %v740_v31  ;;  %v164_v30 = vld [vmem:[#allocation2 + $0x3e0] sm:$0xff]  ;;  %v158_v31 = vld [vmem:[#allocation2 + $0x3b0] sm:$0xff] }
  0x71   :  { %805 = vmatprep.subr.bf16.mxu1 %v804_v35  ;;  %v181_v35 = vld [vmem:[#allocation2 + $0x468] sm:$0xff]  ;;  %v762_v38 = vpack.c.bf16 %v164_v30, %v156_v29  ;;  %v826_v39 = vpack.c.bf16 %v166_v33, %v158_v31  ;;  %v844_v29 = vpack.c.bf16 %v247_v22, %v239_v21  ;;  %v246_v30 = vld [vmem:[#allocation2 + $0x670] sm:$0xff]  ;;  %v255_v33 = vld [vmem:[#allocation2 + $0x6b8] sm:$0xff] }
  0x72   :  { %v764_v40 = vpack.c.bf16 %v181_v35, %v173_v34  ;;  %v253_v31 = vld [vmem:[#allocation2 + $0x6a8] sm:$0xff]  ;;  %v263_v34 = vld [vmem:[#allocation2 + $0x6f8] sm:$0xff] }
  0x73   :  { %743 = vmatpush1.bf16.msra.mxu0 %v742_v41  ;;  %v172_v41 = vld [vmem:[#allocation2 + $0x420] sm:$0xff] }
  0x74   :  { %807 = vmatpush1.bf16.msra.mxu1 %v806_v42  ;;  %745 = vmatprep.subr.bf16.mxu0 %v744_v43  ;;  %v180_v42 = vld [vmem:[#allocation2 + $0x460] sm:$0xff]  ;;  %v174_v43 = vld [vmem:[#allocation2 + $0x430] sm:$0xff] }
  0x75   :  { %809 = vmatprep.subr.bf16.mxu1 %v808_v47  ;;  %v197_v47 = vld [vmem:[#allocation2 + $0x4e8] sm:$0xff]  ;;  %v766_v50 = vpack.c.bf16 %v180_v42, %v172_v41  ;;  %v830_v51 = vpack.c.bf16 %v182_v45, %v174_v43  ;;  %v848_v41 = vpack.c.bf16 %v263_v34, %v255_v33  ;;  %v262_v42 = vld [vmem:[#allocation2 + $0x6f0] sm:$0xff]  ;;  %v271_v45 = vld [vmem:[#allocation2 + $0x738] sm:$0xff] }
  0x76   :  { %v768_v52 = vpack.c.bf16 %v197_v47, %v189_v46  ;;  %v269_v43 = vld [vmem:[#allocation2 + $0x728] sm:$0xff]  ;;  %v279_v46 = vld [vmem:[#allocation2 + $0x778] sm:$0xff] }
  0x77   :  { %747 = vmatpush1.bf16.msra.mxu0 %v746_v53  ;;  %v188_v53 = vld [vmem:[#allocation2 + $0x4a0] sm:$0xff] }
  0x78   :  { %811 = vmatpush1.bf16.msra.mxu1 %v810_v16  ;;  %749 = vmatprep.subr.bf16.mxu0 %v748_v54  ;;  %v196_v16 = vld [vmem:[#allocation2 + $0x4e0] sm:$0xff]  ;;  %v190_v54 = vld [vmem:[#allocation2 + $0x4b0] sm:$0xff] }
  0x79   :  { %813 = vmatprep.subr.bf16.mxu1 %v812_v58  ;;  %v213_v58 = vld [vmem:[#allocation2 + $0x568] sm:$0xff]  ;;  %v770_v61 = vpack.c.bf16 %v196_v16, %v188_v53  ;;  %v834_v62 = vpack.c.bf16 %v198_v56, %v190_v54  ;;  %v852_v53 = vpack.c.bf16 %v279_v46, %v271_v45  ;;  %v278_v16 = vld [vmem:[#allocation2 + $0x770] sm:$0xff]  ;;  %v287_v56 = vld [vmem:[#allocation2 + $0x7b8] sm:$0xff] }
  0x7a   :  { %v772_v63 = vpack.c.bf16 %v213_v58, %v205_v57  ;;  %v285_v54 = vld [vmem:[#allocation2 + $0x7a8] sm:$0xff]  ;;  %v295_v57 = vld [vmem:[#allocation2 + $0x7f8] sm:$0xff] }
  0x7b   :  { %751 = vmatpush1.bf16.msra.mxu0 %v750_v0  ;;  %v204_v0 = vld [vmem:[#allocation2 + $0x520] sm:$0xff] }
  0x7c   :  { %815 = vmatpush1.bf16.msra.mxu1 %v814_v1  ;;  %753 = vmatprep.subr.bf16.mxu0 %v752_v2  ;;  %v212_v1 = vld [vmem:[#allocation2 + $0x560] sm:$0xff]  ;;  %v206_v2 = vld [vmem:[#allocation2 + $0x530] sm:$0xff] }
  0x7d   :  { %817 = vmatprep.subr.bf16.mxu1 %v816_v6  ;;  %v229_v6 = vld [vmem:[#allocation2 + $0x5e8] sm:$0xff]  ;;  %v774_v9 = vpack.c.bf16 %v212_v1, %v204_v0  ;;  %v838_v10 = vpack.c.bf16 %v214_v4, %v206_v2  ;;  %v286_v0 = vld [vmem:[#allocation2 + $0x7b0] sm:$0xff] }
  0x7e   :  { %v776_v11 = vpack.c.bf16 %v229_v6, %v221_v5  ;;  %v294_v1 = vld [vmem:[#allocation2 + $0x7f0] sm:$0xff] }
  0x7f   :  { %755 = vmatpush1.bf16.msra.mxu0 %v754_v12  ;;  %v220_v12 = vld [vmem:[#allocation2 + $0x5a0] sm:$0xff] }
  0x80   :  { %819 = vmatpush1.bf16.msra.mxu1 %v818_v13  ;;  %757 = vmatprep.subr.bf16.mxu0 %v756_v14  ;;  %v228_v13 = vld [vmem:[#allocation2 + $0x5e0] sm:$0xff]  ;;  %v222_v14 = vld [vmem:[#allocation2 + $0x5b0] sm:$0xff] }
  0x81   :  { %821 = vmatprep.subr.bf16.mxu1 %v820_v20  ;;  %v245_v20 = vld [vmem:[#allocation2 + $0x668] sm:$0xff]  ;;  %v778_v23 = vpack.c.bf16 %v228_v13, %v220_v12  ;;  %v842_v24 = vpack.c.bf16 %v230_v18, %v222_v14 }
  0x82   :  { %v780_v25 = vpack.c.bf16 %v245_v20, %v237_v19 }
  0x83   :  { %759 = vmatpush1.bf16.msra.mxu0 %v758_v26  ;;  %v236_v26 = vld [vmem:[#allocation2 + $0x620] sm:$0xff] }
  0x84   :  { %823 = vmatpush1.bf16.msra.mxu1 %v822_v27  ;;  %761 = vmatprep.subr.bf16.mxu0 %v760_v28  ;;  %v244_v27 = vld [vmem:[#allocation2 + $0x660] sm:$0xff]  ;;  %v238_v28 = vld [vmem:[#allocation2 + $0x630] sm:$0xff] }
  0x85   :  { %825 = vmatprep.subr.bf16.mxu1 %v824_v32  ;;  %v261_v32 = vld [vmem:[#allocation2 + $0x6e8] sm:$0xff]  ;;  %v782_v35 = vpack.c.bf16 %v244_v27, %v236_v26  ;;  %v846_v36 = vpack.c.bf16 %v246_v30, %v238_v28 }
  0x86   :  { %v784_v37 = vpack.c.bf16 %v261_v32, %v253_v31 }
  0x87   :  { %763 = vmatpush1.bf16.msra.mxu0 %v762_v38  ;;  %v252_v38 = vld [vmem:[#allocation2 + $0x6a0] sm:$0xff] }
  0x88   :  { %827 = vmatpush1.bf16.msra.mxu1 %v826_v39  ;;  %765 = vmatprep.subr.bf16.mxu0 %v764_v40  ;;  %v260_v39 = vld [vmem:[#allocation2 + $0x6e0] sm:$0xff]  ;;  %v254_v40 = vld [vmem:[#allocation2 + $0x6b0] sm:$0xff] }
  0x89   :  { %829 = vmatprep.subr.bf16.mxu1 %v828_v44  ;;  %v277_v44 = vld [vmem:[#allocation2 + $0x768] sm:$0xff]  ;;  %v786_v47 = vpack.c.bf16 %v260_v39, %v252_v38  ;;  %v850_v48 = vpack.c.bf16 %v262_v42, %v254_v40 }
  0x8a   :  { %v788_v49 = vpack.c.bf16 %v277_v44, %v269_v43 }
  0x8b   :  { %767 = vmatpush1.bf16.msra.mxu0 %v766_v50  ;;  %v268_v50 = vld [vmem:[#allocation2 + $0x720] sm:$0xff] }
  0x8c   :  { %831 = vmatpush1.bf16.msra.mxu1 %v830_v51  ;;  %769 = vmatprep.subr.bf16.mxu0 %v768_v52  ;;  %v276_v51 = vld [vmem:[#allocation2 + $0x760] sm:$0xff]  ;;  %v270_v52 = vld [vmem:[#allocation2 + $0x730] sm:$0xff] }
  0x8d   :  { %833 = vmatprep.subr.bf16.mxu1 %v832_v55  ;;  %v293_v55 = vld [vmem:[#allocation2 + $0x7e8] sm:$0xff]  ;;  %v790_v58 = vpack.c.bf16 %v276_v51, %v268_v50  ;;  %v854_v59 = vpack.c.bf16 %v278_v16, %v270_v52 }
  0x8e   :  { %v792_v60 = vpack.c.bf16 %v293_v55, %v285_v54 }
  0x8f   :  { %771 = vmatpush1.bf16.msra.mxu0 %v770_v61  ;;  %v284_v61 = vld [vmem:[#allocation2 + $0x7a0] sm:$0xff] }
  0x90   :  { %835 = vmatpush1.bf16.msra.mxu1 %v834_v62  ;;  %773 = vmatprep.subr.bf16.mxu0 %v772_v63  ;;  %v292_v62 = vld [vmem:[#allocation2 + $0x7e0] sm:$0xff]  ;;  %v856_v63 = vpack.c.bf16 %v295_v57, %v287_v56 }
  0x91   :  { %837 = vmatprep.subr.bf16.mxu1 %v836_v3  ;;  %v794_v2 = vpack.c.bf16 %v292_v62, %v284_v61  ;;  %v858_v3 = vpack.c.bf16 %v294_v1, %v286_v0 }
  0x93   :  { %775 = vmatpush1.bf16.msra.mxu0 %v774_v9 }
  0x94   :  { %839 = vmatpush1.bf16.msra.mxu1 %v838_v10  ;;  %777 = vmatprep.subr.bf16.mxu0 %v776_v11 }
  0x95   :  { %841 = vmatprep.subr.bf16.mxu1 %v840_v17 }
  0x97   :  { %779 = vmatpush1.bf16.msra.mxu0 %v778_v23 }
  0x98   :  { %843 = vmatpush1.bf16.msra.mxu1 %v842_v24  ;;  %781 = vmatprep.subr.bf16.mxu0 %v780_v25 }
  0x99   :  { %845 = vmatprep.subr.bf16.mxu1 %v844_v29 }
  0x9b   :  { %783 = vmatpush1.bf16.msra.mxu0 %v782_v35 }
  0x9c   :  { %847 = vmatpush1.bf16.msra.mxu1 %v846_v36  ;;  %785 = vmatprep.subr.bf16.mxu0 %v784_v37 }
  0x9d   :  { %849 = vmatprep.subr.bf16.mxu1 %v848_v41 }
  0x9f   :  { %787 = vmatpush1.bf16.msra.mxu0 %v786_v47 }
  0xa0   :  { %851 = vmatpush1.bf16.msra.mxu1 %v850_v48  ;;  %789 = vmatprep.subr.bf16.mxu0 %v788_v49 }
  0xa1   :  { %853 = vmatprep.subr.bf16.mxu1 %v852_v53 }
  0xa3   :  { %791 = vmatpush1.bf16.msra.mxu0 %v790_v58 }
  0xa4   :  { %855 = vmatpush1.bf16.msra.mxu1 %v854_v59  ;;  %793 = vmatprep.subr.bf16.mxu0 %v792_v60 }
  0xa5   :  { %857 = vmatprep.subr.bf16.mxu1 %v856_v63 }
  0xa7   :  { %795 = vmatpush1.bf16.msra.mxu0 %v794_v2 }
  0xa8   :  { %859 = vmatpush1.bf16.msra.mxu1 %v858_v3 }
  0xaa   :  { %503 = vmatmul.mubr.f32.vlgmr.msra.gmra.mrb[2].mxu0 %v985_v15 }
  0xab   :  { %574 = vmatmul.mubr.f32.vlgmr.msra.gmra.mrb[2].mxu1 %v985_v15 }
 0x13d   :  { %v362_v4 = vpop.f32.mrb[0].mxu0 }
 0x13e   :  { %580 = vst [vmem:[#allocation7] sm:$0xff] %v362_v4  ;;  %v433_v5 = vpop.f32.mrb[0].mxu1  ;;  %v364_v6 = vpop.f32.mrb[1].mxu0 }
 0x13f   :  { %582 = vst [vmem:[#allocation7 + $0x10] sm:$0xff] %v433_v5  ;;  %581 = vst [vmem:[#allocation7 + $0x8] sm:$0xff] %v364_v6  ;;  %v435_v7 = vpop.f32.mrb[1].mxu1 }
 0x140   :  { %583 = vst [vmem:[#allocation7 + $0x18] sm:$0xff] %v435_v7 }
 0x17d   :  { %v504_v8 = vpop.f32.mrb[2].mxu0 }
 0x17e   :  { %584 = vst [vmem:[#allocation7 + $0x20] sm:$0xff] %v504_v8  ;;  %v575_v9 = vpop.f32.mrb[2].mxu1  ;;  %v506_v10 = vpop.f32.mrb[3].mxu0 }
 0x17f   :  { %586 = vst [vmem:[#allocation7 + $0x30] sm:$0xff] %v575_v9  ;;  %585 = vst [vmem:[#allocation7 + $0x28] sm:$0xff] %v506_v10  ;;  %v577_v11 = vpop.f32.mrb[3].mxu1 }
 0x180   :  { %587 = vst [vmem:[#allocation7 + $0x38] sm:$0xff] %v577_v11 }
 0x181   :  { %920 = shalt.err (!%p917_p6)
}
 0x182   :  { %s921_s10 = scalar_lea.hbm %s1007_s2, 1024 }
 0x183   :  { %p922_p7 = scmp.ne.s32.totalorder %s1007_s2, %s921_s10  ;;  %p925_p8 = scmp.lt.u32.totalorder %s921_s10, %s1007_s2 }
 0x185   :  { %p927_p9 = pnand %p925_p8, %p922_p7 }
 0x187   :  { %930 = shalt.err (!%p927_p9)
}
 0x188   :  { %597 = dma.vmem_to_hbm [thread:$0]  %s595_s6, 1024, %s1007_s2, [#allocation4]  }
 0x189   :  { %935 = dma.done.wait [#allocation4], 1024  }
 0x18a   :  { %936 = vsyncadd [#allocation4], 4294966272 }
 0x18b   :  { %601 = vsyncpa [#allocation3], 1 }
 0x18c   :  { %602 = vsyncpa [#allocation6], 1 }
 0x18d   :  { %603 = vsyncpa [#allocation4], 1 }

</bundles_post_ra>
